<compile_context>
chip_gen: v5e
topology: v5e:2x2
jax: 0.10.0
libtpu: 0.0.40
codegen_flags: <defaults>
</compile_context>

<pallas_src>
import functools
import math

import jax
import jax.numpy as jnp
from jax.experimental import pallas as pl
from jax.experimental.pallas import tpu as pltpu

_MiB = 1024 * 1024


def _sublane_pack(dtype) -> int:
    """Rows per packed (sublane, lane) tile: 8 for f32, 16 for bf16, 32 for int8/fp8."""
    return max(8, 32 // jnp.dtype(dtype).itemsize)


def _pe_kernel(x_ref, pe_ref, o_ref, *, scale):
    # x_ref/o_ref: (bb, tr, D) or (tr, D) when the batch dim is squeezed.
    # pe_ref: (tr, D); broadcasts over the leading batch-block dim if present.
    x = x_ref[...].astype(jnp.float32)
    pe = pe_ref[...].astype(jnp.float32)
    o_ref[...] = (x * scale + pe).astype(o_ref.dtype)


def make_pe_table(d_model: int, max_seq_len: int) -> jnp.ndarray:
    """Vectorized equivalent of the PyTorch double loop building `pe`.

    Matches the module exactly: sin uses exponent 2*i/d_model and cos uses
    2*(i+1)/d_model with i the even column index (tutorial variant, not the paper).
    """
    pos = jnp.arange(max_seq_len, dtype=jnp.float32)[:, None]          # (L, 1)
    i_even = jnp.arange(0, d_model, 2, dtype=jnp.float32)[None, :]     # (1, D/2)
    sin_part = jnp.sin(pos / jnp.power(10000.0, 2.0 * i_even / d_model))
    cos_part = jnp.cos(pos / jnp.power(10000.0, 2.0 * (i_even + 1.0) / d_model))
    pe = jnp.stack([sin_part, cos_part], axis=-1).reshape(max_seq_len, d_model)
    return pe.astype(jnp.float32)


def _choose_row_tile(rows: int, row_bytes: int, pack: int, target_bytes: int) -> int:
    """Row-tile for the second-to-last dim: multiple of `pack` and <= target_bytes.
    Prefers an exact divisor of `rows`; otherwise the grid uses pl.cdiv with a
    masked edge block (never falls back to an oversized full-extent tile)."""
    if rows * row_bytes <= target_bytes:
        return rows                                   # whole extent in one tile
    max_rows = max(pack, (target_bytes // max(row_bytes, 1)) // pack * pack)
    max_rows = min(max_rows, rows)
    if max_rows < pack:                               # rows < pack: full dim is legal
        return rows
    for tr in range(max_rows, pack - 1, -pack):       # prefer a dividing tile
        if rows % tr == 0:
            return tr
    return max_rows                                   # non-dividing -> pl.cdiv grid


def _choose_batch_block(batch: int, per_batch_bytes: int, target_bytes: int) -> int:
    """Block several batch elements per step when the per-batch payload is tiny."""
    if batch <= 1 or per_batch_bytes >= 512 * 1024:
        return 1
    bb = int(min(batch, max(1, target_bytes // max(per_batch_bytes, 1))))
    while bb > 1 and batch % bb != 0:                 # keep the batch grid exact
        bb -= 1
    return bb


def positional_encoder(x: jnp.ndarray, pe_full: jnp.ndarray, d_model: int,
                       *, target_tile_bytes: int | None = None) -> jnp.ndarray:
    """x: (B, S, D).  pe_full: (max_seq_len, D) float32.  out = x*sqrt(D)+pe[:S]."""
    B, S, D = x.shape
    assert D == d_model
    scale = float(math.sqrt(d_model))

    # Generation-aware budgets (v5e/v6e: 128 MiB VMEM; v7x: 64 MiB).
    try:
        vmem_cap = int(pltpu.get_tpu_info().vmem_capacity_bytes)
    except Exception:
        vmem_cap = 64 * _MiB                          # conservative (v7x) default
    vmem_limit = max(32 * _MiB, min(64 * _MiB, vmem_cap // 2))
    if target_tile_bytes is None:
        target_tile_bytes = 8 * _MiB if vmem_cap >= 96 * _MiB else 4 * _MiB

    # pe carried in x's dtype (smaller HBM stream / VMEM tile); math stays f32.
    pe = pe_full[:S, :].astype(x.dtype)               # like self.pe[:, :seq_len]

    itemsize = jnp.dtype(x.dtype).itemsize
    pack = _sublane_pack(x.dtype)

    tr = _choose_row_tile(S, D * itemsize, pack, target_tile_bytes)
    per_batch_tile_bytes = tr * D * itemsize
    bb = _choose_batch_block(B, per_batch_tile_bytes, target_tile_bytes)

    grid_r = pl.cdiv(S, tr)
    grid_b = pl.cdiv(B, bb)

    # Megacore balance (v7x has 2 TCs): avoid a single-step grid for non-trivial tiles.
    if grid_r * grid_b == 1 and bb * per_batch_tile_bytes > 64 * 1024:
        if S >= 2 * pack:
            tr = pack * pl.cdiv(pl.cdiv(S, 2), pack)
            grid_r = pl.cdiv(S, tr)
        elif B >= 2:
            bb = pl.cdiv(B, 2)
            grid_b = pl.cdiv(B, bb)

    if bb == 1:
        x_block = (pl.Squeezed(), tr, D)              # 2-D body, no size-1 broadcast
    else:
        x_block = (bb, tr, D)                         # several sequences per step

    kernel = functools.partial(_pe_kernel, scale=scale)
    out = pl.pallas_call(
        kernel,
        out_shape=jax.ShapeDtypeStruct((B, S, D), x.dtype),
        grid_spec=pltpu.PrefetchScalarGridSpec(
            num_scalar_prefetch=0,
            # Row-tile axis outermost: pe block index is constant across the inner
            # batch axis, so its tile stays resident across that loop.
            grid=(grid_r, grid_b),
            in_specs=[
                pl.BlockSpec(x_block, lambda r, b: (b, r, 0)),
                pl.BlockSpec((tr, D), lambda r, b: (r, 0)),
            ],
            out_specs=pl.BlockSpec(x_block, lambda r, b: (b, r, 0)),
        ),
        compiler_params=pltpu.CompilerParams(
            dimension_semantics=("parallel", "parallel"),
            vmem_limit_bytes=vmem_limit,
        ),
    )(x, pe)
    return out


if __name__ == "__main__":
    # Small shapes consistent with the module: (batch, seq, d_model).
    B, S, D = 2, 8, 32
    MAX_SEQ_LEN = 64

    key = jax.random.PRNGKey(0)
    x = jax.random.normal(key, (B, S, D), dtype=jnp.float32)
    pe_full = make_pe_table(d_model=D, max_seq_len=MAX_SEQ_LEN)

    out = jax.block_until_ready(positional_encoder(x, pe_full, d_model=D))
    ref = x * math.sqrt(D) + pe_full[None, :S, :]
    assert out.shape == (B, S, D)
    assert jnp.allclose(out, ref, atol=1e-5, rtol=1e-5)

    # Seq-tiled path: small tile budget forces grid_r > 1 with a dividing tile.
    x_t = jax.random.normal(jax.random.PRNGKey(1), (2, 64, D), dtype=jnp.float32)
    out_t = jax.block_until_ready(
        positional_encoder(x_t, pe_full, d_model=D, target_tile_bytes=4096))
    ref_t = x_t * math.sqrt(D) + pe_full[None, :64, :]
    assert jnp.allclose(out_t, ref_t, atol=1e-5, rtol=1e-5)

    # Non-dividing seq length: tr=8 does not divide S=20 -> pl.cdiv grid + masked edge.
    S3 = 20
    pe32 = make_pe_table(d_model=D, max_seq_len=32)
    x3 = jax.random.normal(jax.random.PRNGKey(2), (2, S3, D), dtype=jnp.float32)
    out3 = jax.block_until_ready(
        positional_encoder(x3, pe32, d_model=D, target_tile_bytes=1024))
    ref3 = x3 * math.sqrt(D) + pe32[None, :S3, :]
    assert jnp.allclose(out3, ref3, atol=1e-5, rtol=1e-5)

    # Narrow / non-128 D with bf16 inputs (dtype-aware sublane pack = 16, bf16 pe).
    D4 = 24
    pe24 = make_pe_table(d_model=D4, max_seq_len=64)
    x4 = jax.random.normal(jax.random.PRNGKey(3), (4, 64, D4), dtype=jnp.bfloat16)
    out4 = jax.block_until_ready(
        positional_encoder(x4, pe24, d_model=D4, target_tile_bytes=2048))
    ref4 = x4.astype(jnp.float32) * math.sqrt(D4) + pe24[None, :64, :]
    assert out4.dtype == jnp.bfloat16
    assert jnp.allclose(out4.astype(jnp.float32), ref4, atol=2e-1, rtol=2e-2)

    # Batch-blocked path: tiny per-batch payload -> several sequences per grid step.
    x5 = jax.random.normal(jax.random.PRNGKey(4), (8, 8, D), dtype=jnp.float32)
    out5 = jax.block_until_ready(positional_encoder(x5, pe_full, d_model=D))
    ref5 = x5 * math.sqrt(D) + pe_full[None, :8, :]
    assert jnp.allclose(out5, ref5, atol=1e-5, rtol=1e-5)

    print("KERNEL_OK")
</pallas_src>

<mosaic_0001>
module attributes {stable_mosaic.version = 11 : i64} {
  func.func @_pe_kernel(%arg0: i32, %arg1: i32, %arg2: memref<2x8x32xf32, #tpu.memory_space<vmem>>, %arg3: memref<8x32xf32, #tpu.memory_space<vmem>>, %arg4: memref<2x8x32xf32, #tpu.memory_space<vmem>>) attributes {dimension_semantics = [#tpu.dimension_semantics<parallel>, #tpu.dimension_semantics<parallel>], iteration_bounds = array<i64: 1, 1>, scalar_prefetch = 0 : i64, scratch_operands = 0 : i64, tpu.core_type = #tpu.core_type<tc>, window_params = [{transform_indices = @transform_0, window_bounds = array<i64: 2, 8, 32>}, {transform_indices = @transform_1, window_bounds = array<i64: 8, 32>}, {transform_indices = @transform_2, window_bounds = array<i64: 2, 8, 32>}]} {
    %c0 = arith.constant 0 : index
    %c0_0 = arith.constant 0 : index
    %c0_1 = arith.constant 0 : index
    %0 = vector.load %arg2[%c0, %c0_0, %c0_1] : memref<2x8x32xf32, #tpu.memory_space<vmem>>, vector<2x8x32xf32>
    %c0_2 = arith.constant 0 : index
    %c0_3 = arith.constant 0 : index
    %1 = vector.load %arg3[%c0_2, %c0_3] : memref<8x32xf32, #tpu.memory_space<vmem>>, vector<8x32xf32>
    %cst = arith.constant 5.65685415 : f32
    %2 = vector.broadcast %cst : f32 to vector<2x8x32xf32>
    %3 = arith.mulf %0, %2 : vector<2x8x32xf32>
    %4 = vector.shape_cast %1 : vector<8x32xf32> to vector<1x8x32xf32>
    %5 = vector.broadcast %4 : vector<1x8x32xf32> to vector<2x8x32xf32>
    %6 = arith.addf %3, %5 : vector<2x8x32xf32>
    %c0_4 = arith.constant 0 : index
    %c0_5 = arith.constant 0 : index
    %c0_6 = arith.constant 0 : index
    %7 = vector.load %arg4[%c0_4, %c0_5, %c0_6] : memref<2x8x32xf32, #tpu.memory_space<vmem>>, vector<2x8x32xf32>
    tpu.vector_store %arg4[%c0_4, %c0_5, %c0_6], %6 {strides = array<i32>} : memref<2x8x32xf32, #tpu.memory_space<vmem>>, vector<2x8x32xf32>,
    return
  }
  func.func @transform_0(%arg0: i32, %arg1: i32) -> (i32, i32, i32) {
    %c0_i32 = arith.constant 0 : i32
    %c0_i32_0 = arith.constant 0 : i32
    return %arg1, %arg0, %c0_i32 : i32, i32, i32
  }
  func.func @transform_1(%arg0: i32, %arg1: i32) -> (i32, i32) {
    %c0_i32 = arith.constant 0 : i32
    %c0_i32_0 = arith.constant 0 : i32
    return %arg0, %c0_i32 : i32, i32
  }
  func.func @transform_2(%arg0: i32, %arg1: i32) -> (i32, i32, i32) {
    %c0_i32 = arith.constant 0 : i32
    %c0_i32_0 = arith.constant 0 : i32
    return %arg1, %arg0, %c0_i32 : i32, i32, i32
  }
}

</mosaic_0001>

<bundles_post_ra>
// kernel: tpu_custom_call.1
= control target key start
LH: loop header
LB: loop body
LE: loop exit
PB: predicated region body
PF: predicated region fallthrough
CT: control target
= control target key end

     0   :  { %7 = vsyncpa [#allocation3], 0  ;;  %s190_s0 = inlined_call_operand.hbm [shape: f32[2,8,32], index: 0, kind: input, shape index: {}]   ;;  %s191_s1 = inlined_call_operand.hbm [shape: f32[8,32], index: 1, kind: input, shape index: {}]   ;;  %s192_s2 = inlined_call_operand.hbm [shape: f32[2,8,32], index: 2, kind: output, shape index: {}]  }
   0x1   :  { %8 = vsyncpa [#allocation6], 0 }
   0x2   :  { %9 = vsyncpa [#allocation4], 0  ;;  %s14_s11 = sshll.u32 %s190_s0, 4  ;;  %s155_s12 = smov [#allocation2]   ;;  %s15_s11 = int_to_ptr.hbm [resolvable:$true] %s14_s11 }
   0x3   :  { %s16_s13 = sshll.u32 %s155_s12, 4  ;;  %s28_s16 = sshll.u32 %s191_s1, 4  ;;  %s17_s13 = int_to_ptr.vmem [resolvable:$true] %s16_s13  ;;  %s29_s16 = int_to_ptr.hbm [resolvable:$true] %s28_s16 }
   0x4   :  { %s156_s17 = smov 128   ;;  %s157_s18 = smov 8  }
   0x5   :  { %22 = dma.hbm_to_vmem [thread:$0]  %s15_s11, 256, %s17_s13, [#allocation3], %s156_s17, %s156_s17, %s157_s18  }
   0x6   :  { %s158_s19 = smov [#allocation5]  }
   0x7   :  { %s30_s20 = sshll.u32 %s158_s19, 4  ;;  %s31_s20 = int_to_ptr.vmem [resolvable:$true] %s30_s20 }
   0x8   :  { %33 = dma.hbm_to_vmem [thread:$0]  %s29_s16, 128, %s31_s20, [#allocation6]  }
   0x9   :  { %149 = dma.done.wait [#allocation3], 256  }
   0xa   :  { %150 = vsyncadd [#allocation3], 4294967040 }
   0xb   :  { %151 = dma.done.wait [#allocation6], 128  }
   0xc   :  { %152 = vsyncadd [#allocation6], 4294967168  ;;  %v42_v0 = vld [vmem:[#allocation2] sm:$0xff]  ;;  %v44_v1 = vld [vmem:[#allocation5] sm:$0xff]  ;;  %s159_s0 = smov [#allocation7]   ;;  %s58_s23 = sshll.u32 %s192_s2, 4  ;;  %s59_s23 = int_to_ptr.hbm [resolvable:$true] %s58_s23 }
   0xd   :  { %v43_v2 = vld [vmem:[#allocation2 + $0x8] sm:$0xff]  ;;  %v45_v3 = vmul.f32 5.656854, %v42_v0  ;;  %s56_s1 = sshll.u32 %s159_s0, 4  ;;  %vm49_vm0 = vcmask 261120   ;;  %s57_s1 = int_to_ptr.vmem [resolvable:$true] %s56_s1 }
   0xe   :  { %v46_v4 = vmul.f32 5.656854, %v43_v2 }
   0xf   :  { %v47_v5 = vadd.f32 %v45_v3, %v44_v1 }
  0x10   :  { %v48_v6 = vadd.f32 %v46_v4, %v44_v1 }
  0x11   :  { %50 = vst.msk [vmem:[#allocation7] sm:$0xff] %vm49_vm0, %v47_v5 }
  0x12   :  { %51 = vst.msk [vmem:[#allocation7 + $0x8] sm:$0xff] %vm49_vm0, %v48_v6 }
  0x13   :  { %64 = dma.vmem_to_hbm [thread:$0]  %s57_s1, 256, %s59_s23, [#allocation4], %s156_s17, %s156_s17, %s157_s18  }
  0x14   :  { %153 = dma.done.wait [#allocation4], 256  }
  0x15   :  { %154 = vsyncadd [#allocation4], 4294967040 }
  0x16   :  { %69 = vsyncpa [#allocation3], 1 }
  0x17   :  { %70 = vsyncpa [#allocation6], 1 }
  0x18   :  { %71 = vsyncpa [#allocation4], 1 }

</bundles_post_ra>
